<compile_context>
chip_gen: v5e
topology: v5e:2x2
jax: 0.10.0
libtpu: 0.0.40
codegen_flags: <defaults>
</compile_context>

<pallas_src>
import functools

import jax
import jax.numpy as jnp
from jax import lax
from jax.experimental import pallas as pl
from jax.experimental.pallas import tpu as pltpu

_LANE = 128
_SUBLANE = 8
_SMALL_INPUT_ELEMS = 1 << 20   # below this, fused XLA beats a kernel launch


def _round_up(v, m):
    return ((v + m - 1) // m) * m


def _vmem_physical_bytes():
    """Physical VMEM of the local TPU generation (conservative fallback)."""
    try:
        info = pltpu.get_tpu_info()
        cap = getattr(info, "vmem_capacity_bytes", None)
        if cap:
            return int(cap)
    except Exception:
        pass
    return 64 * 1024 * 1024      # v7x-sized fallback; safe on v5e/v6e too


def _tile_sizes(B, F, c_pad, x_itemsize, w_itemsize, vmem_budget):
    """Pick (tb, tk) so all kernel buffers fit the per-generation VMEM budget."""
    usable = int(vmem_budget * 0.85)            # headroom for compiler scratch

    # --- feature (K) tile ---------------------------------------------------
    # Bytes per K column assuming a minimum-viable batch tile, double-buffered.
    min_rows = min(256, max(_round_up(B, _SUBLANE), _SUBLANE))
    per_col = 2 * min_rows * x_itemsize + 2 * c_pad * w_itemsize
    fixed = 3 * min_rows * c_pad * 4 + min_rows * 4        # out(x2) + acc + ssq
    max_cols = max((usable - fixed) // per_col, _LANE)
    if F <= max_cols:
        tk = F                                   # whole feature dim in one tile
    else:
        cap = (max_cols // _LANE) * _LANE
        tk = cap
        for cand in range(cap, _LANE - 1, -_LANE):   # prefer an exact divisor
            if F % cand == 0:
                tk = cand
                break
    num_k = pl.cdiv(F, tk)

    # --- batch tile -----------------------------------------------------------
    w_bufs = 1 if num_k == 1 else 2              # resident vs. streamed weight
    fixed_w = w_bufs * tk * c_pad * w_itemsize
    per_row = 2 * tk * x_itemsize + 3 * c_pad * 4 + 4   # x(x2) + out(x2)+acc + ssq
    max_rows = max((usable - fixed_w) // per_row, _SUBLANE)
    if B <= _SUBLANE:
        tb = B                                   # block == full batch dim
    else:
        tb = min(_round_up(B, _SUBLANE), (max_rows // _SUBLANE) * _SUBLANE, 4096)
        tb = max(tb, _SUBLANE)
        if pl.cdiv(B, tb) < 2:
            # >= 2 batch tiles so the "parallel" axis can use both TensorCores
            # on v7x (one extra ~0.35us step on single-core v5e/v6e).
            tb = _round_up(pl.cdiv(B, 2), _SUBLANE)
    return tb, tk


def apc_kernel(x_ref, w_ref, o_ref, acc_ref, ssq_ref, *, f_total):
    """One (batch-tile, K-tile) step: accumulate x@w and the row sum-of-squares."""
    k = pl.program_id(1)

    @pl.when(k == 0)
    def _init():
        acc_ref[...] = jnp.zeros_like(acc_ref)
        ssq_ref[...] = jnp.zeros_like(ssq_ref)

    x = x_ref[...]                    # (tb, tk), input dtype
    w = w_ref[...]                    # (tk, c_pad)
    tk = x.shape[-1]
    if f_total % tk != 0:
        # Ragged trailing K tile: zero the out-of-range feature columns that
        # Pallas padded with unspecified data (mask both operands so 0*garbage
        # cannot produce NaN).  Static branch - only traced when F % tk != 0.
        col = k * tk + lax.broadcasted_iota(jnp.int32, x.shape, 1)
        x = jnp.where(col < f_total, x, jnp.zeros_like(x))
        row = k * tk + lax.broadcasted_iota(jnp.int32, w.shape, 0)
        w = jnp.where(row < f_total, w, jnp.zeros_like(w))

    # Row sum-of-squares: input-dtype multiply, f32 accumulation (avoids a
    # (tb, tk) f32 temporary for bf16 inputs; f32 inputs are unchanged).
    ssq_ref[...] += jnp.sum(x * x, axis=-1, keepdims=True, dtype=jnp.float32)
    # Rescale AFTER the matmul: (x / n) @ w == (x @ w) / n.
    acc_ref[...] += jnp.dot(x, w, preferred_element_type=jnp.float32)

    @pl.when(k == pl.num_programs(1) - 1)
    def _finalize():
        # clamp(sqrt(s), min=1e-9) == sqrt(clamp(s, min=1e-18)); rsqrt -> EUP.
        inv = lax.rsqrt(jnp.maximum(ssq_ref[...], 1e-18))
        o_ref[...] = (acc_ref[...] * inv).astype(o_ref.dtype)


def pad_weight_lanes(w):
    """Pad the class dim to a multiple of 128 (lane-dense stores).  Call ONCE,
    outside the per-call path, so the pad is not re-issued every invocation."""
    f, c = w.shape
    c_pad = _round_up(c, _LANE)
    if c_pad == c:
        return w
    return jnp.zeros((f, c_pad), dtype=w.dtype).at[:, :c].set(w)


@functools.partial(jax.jit, static_argnames=("num_classes", "force_kernel"))
def apc_forward(x, w_padded, num_classes, force_kernel=False):
    """Dressed-net forward: per-row L2 normalization + parameterized map."""
    B, F = x.shape
    Fw, c_cols = w_padded.shape
    assert Fw == F and num_classes <= c_cols
    if c_cols % _LANE != 0:
        # Fallback only; prefer pad_weight_lanes() once outside this function.
        c_pad = _round_up(c_cols, _LANE)
        w_padded = jnp.zeros((F, c_pad), w_padded.dtype).at[:, :c_cols].set(w_padded)
    else:
        c_pad = c_cols

    if not force_kernel and B * F < _SMALL_INPUT_ELEMS:
        # Tiny inputs: the pallas_call would be pure launch overhead; let XLA fuse.
        ssq = jnp.sum(x * x, axis=-1, keepdims=True, dtype=jnp.float32)
        xn = x * lax.rsqrt(jnp.maximum(ssq, 1e-18)).astype(x.dtype)
        return jnp.dot(xn, w_padded[:, :num_classes],
                       preferred_element_type=jnp.float32)

    phys_vmem = _vmem_physical_bytes()
    vmem_budget = phys_vmem // 2            # leave half of physical as headroom
    tb, tk = _tile_sizes(B, F, c_pad, x.dtype.itemsize,
                         w_padded.dtype.itemsize, vmem_budget)
    num_b = pl.cdiv(B, tb)
    num_k = pl.cdiv(F, tk)

    if num_k == 1:
        # Constant weight block: keep it VMEM-resident and single-buffered
        # instead of letting the pipeline double-buffer a never-changing tile.
        w_spec = pl.BlockSpec(memory_space=pltpu.MemorySpace.VMEM)
        w_hbm_reads = 1
    else:
        # K-tiled: (tk, c_pad) slices are streamed (double-buffered) per batch tile.
        w_spec = pl.BlockSpec((tk, c_pad), lambda i, k: (k, 0))
        w_hbm_reads = num_b

    out = pl.pallas_call(
        functools.partial(apc_kernel, f_total=F),
        out_shape=jax.ShapeDtypeStruct((B, c_pad), jnp.float32),
        grid=(num_b, num_k),                          # reduction (K) axis last
        in_specs=[
            pl.BlockSpec((tb, tk), lambda i, k: (i, k)),   # pipelined x tiles
            w_spec,
        ],
        out_specs=pl.BlockSpec((tb, c_pad), lambda i, k: (i, 0)),
        scratch_shapes=[
            pltpu.VMEM((tb, c_pad), jnp.float32),     # matmul accumulator
            pltpu.VMEM((tb, 1), jnp.float32),         # row sum-of-squares
        ],
        compiler_params=pltpu.CompilerParams(
            dimension_semantics=("parallel", "arbitrary"),
            vmem_limit_bytes=int(vmem_budget),
        ),
        cost_estimate=pl.CostEstimate(
            flops=2 * B * F * c_pad,
            transcendentals=B,
            bytes_accessed=(
                B * F * x.dtype.itemsize
                + w_hbm_reads * F * c_pad * w_padded.dtype.itemsize
                + B * c_pad * 4
            ),
        ),
    )(x, w_padded)
    return out[:, :num_classes]


def build_surrogate_weight(q_params, n_features, target_class):
    """Deterministically expand the flat q_params vector into an (F, C) map."""
    needed = n_features * target_class
    reps = (needed + q_params.shape[0] - 1) // q_params.shape[0]
    tiled = jnp.tile(q_params, reps)[:needed]
    return tiled.reshape(n_features, target_class)


if __name__ == "__main__":
    # args from the module's __init__ / forward, at small synthetic sizes.
    n_qubits = 4
    q_depth = 4
    q_delta = 0.01
    target_class = 4
    batch = 8
    n_features = 2 ** n_qubits          # amplitude-encoding feature size = 16

    key = jax.random.PRNGKey(0)
    k_x, k_p = jax.random.split(key)

    # deterministic inputs and parameters (q_params ~ q_delta * randn, as in __init__)
    x = jax.random.normal(k_x, (batch, n_features), dtype=jnp.float32)
    q_params = q_delta * jax.random.normal(
        k_p, (q_depth * n_qubits * 3,), dtype=jnp.float32
    )
    w = build_surrogate_weight(q_params, n_features, target_class)
    w_p = pad_weight_lanes(w)           # lane-pad once, outside the call path

    out = apc_forward(x, w_p, target_class, force_kernel=True)
    out = jax.block_until_ready(out)

    # sanity check against a plain-JAX reference of the same computation
    xn_ref = x / jnp.maximum(
        jnp.sqrt(jnp.sum(x * x, axis=-1, keepdims=True)), 1e-9
    )
    ref = xn_ref @ w
    assert out.shape == (batch, target_class)
    assert jnp.allclose(out, ref, atol=1e-5, rtol=1e-5)

    print("KERNEL_OK")
</pallas_src>

<mosaic_0001>
module attributes {stable_mosaic.version = 11 : i64} {
  func.func @apc_kernel(%arg0: i32, %arg1: i32, %arg2: memref<8x16xf32, #tpu.memory_space<vmem>>, %arg3: memref<16x128xf32, #tpu.memory_space<vmem>>, %arg4: memref<8x128xf32, #tpu.memory_space<vmem>>, %arg5: memref<8x128xf32, #tpu.memory_space<vmem>>, %arg6: memref<8x1xf32, #tpu.memory_space<vmem>>) attributes {dimension_semantics = [#tpu.dimension_semantics<parallel>, #tpu.dimension_semantics<arbitrary>], iteration_bounds = array<i64: 1, 1>, scalar_prefetch = 0 : i64, scratch_operands = 2 : i64, tpu.core_type = #tpu.core_type<tc>, window_params = [{transform_indices = @transform_0, window_bounds = array<i64: 8, 16>}, {pipeline_mode = #tpu.pipeline_mode<synchronous>, transform_indices = @transform_1, window_bounds = array<i64: 16, 128>}, {transform_indices = @transform_2, window_bounds = array<i64: 8, 128>}]} {
    %c0_i32 = arith.constant 0 : i32
    %0 = arith.cmpi eq, %arg1, %c0_i32 : i32
    %1 = arith.extui %0 : i1 to i32
    %c0_i32_0 = arith.constant 0 : i32
    %2 = arith.cmpi ne, %1, %c0_i32_0 : i32
    scf.if %2 {
      %cst_15 = arith.constant 0.000000e+00 : f32
      %18 = vector.broadcast %cst_15 : f32 to vector<8x128xf32>
      %c0_16 = arith.constant 0 : index
      %c0_17 = arith.constant 0 : index
      %19 = vector.load %arg5[%c0_16, %c0_17] : memref<8x128xf32, #tpu.memory_space<vmem>>, vector<8x128xf32>
      tpu.vector_store %arg5[%c0_16, %c0_17], %18 {strides = array<i32>} : memref<8x128xf32, #tpu.memory_space<vmem>>, vector<8x128xf32>,
      %cst_18 = arith.constant 0.000000e+00 : f32
      %20 = vector.broadcast %cst_18 : f32 to vector<8x1xf32>
      %c0_19 = arith.constant 0 : index
      %c0_20 = arith.constant 0 : index
      %21 = vector.load %arg6[%c0_19, %c0_20] : memref<8x1xf32, #tpu.memory_space<vmem>>, vector<8x1xf32>
      tpu.vector_store %arg6[%c0_19, %c0_20], %20 {strides = array<i32>} : memref<8x1xf32, #tpu.memory_space<vmem>>, vector<8x1xf32>,
    } else {
    }
    %c0 = arith.constant 0 : index
    %c0_1 = arith.constant 0 : index
    %3 = vector.load %arg2[%c0, %c0_1] : memref<8x16xf32, #tpu.memory_space<vmem>>, vector<8x16xf32>
    %c0_2 = arith.constant 0 : index
    %c0_3 = arith.constant 0 : index
    %4 = vector.load %arg3[%c0_2, %c0_3] : memref<16x128xf32, #tpu.memory_space<vmem>>, vector<16x128xf32>
    %c0_4 = arith.constant 0 : index
    %c0_5 = arith.constant 0 : index
    %5 = vector.load %arg6[%c0_4, %c0_5] : memref<8x1xf32, #tpu.memory_space<vmem>>, vector<8x1xf32>
    %6 = arith.mulf %3, %3 : vector<8x16xf32>
    %cst = arith.constant dense<0.000000e+00> : vector<8xf32>
    %7 = vector.multi_reduction <add>, %6, %cst [1] : vector<8x16xf32> to vector<8xf32>
    %8 = vector.shape_cast %7 : vector<8xf32> to vector<8x1xf32>
    %9 = arith.addf %5, %8 : vector<8x1xf32>
    %c0_6 = arith.constant 0 : index
    %c0_7 = arith.constant 0 : index
    %10 = vector.load %arg6[%c0_6, %c0_7] : memref<8x1xf32, #tpu.memory_space<vmem>>, vector<8x1xf32>
    tpu.vector_store %arg6[%c0_6, %c0_7], %9 {strides = array<i32>} : memref<8x1xf32, #tpu.memory_space<vmem>>, vector<8x1xf32>,
    %c0_8 = arith.constant 0 : index
    %c0_9 = arith.constant 0 : index
    %11 = vector.load %arg5[%c0_8, %c0_9] : memref<8x128xf32, #tpu.memory_space<vmem>>, vector<8x128xf32>
    %cst_10 = arith.constant dense<0.000000e+00> : vector<8x128xf32>
    %12 = tpu.matmul %3, %4, %cst_10 {dimension_numbers = #tpu.dot_dimension_numbers<[1], [0], [0], [1], [0, 0, 1, 1], [], []>} : vector<8x16xf32>, vector<16x128xf32>, vector<8x128xf32> -> vector<8x128xf32>
    %13 = arith.addf %11, %12 : vector<8x128xf32>
    %c0_11 = arith.constant 0 : index
    %c0_12 = arith.constant 0 : index
    %14 = vector.load %arg5[%c0_11, %c0_12] : memref<8x128xf32, #tpu.memory_space<vmem>>, vector<8x128xf32>
    tpu.vector_store %arg5[%c0_11, %c0_12], %13 {strides = array<i32>} : memref<8x128xf32, #tpu.memory_space<vmem>>, vector<8x128xf32>,
    %c0_i32_13 = arith.constant 0 : i32
    %15 = arith.cmpi eq, %arg1, %c0_i32_13 : i32
    %16 = arith.extui %15 : i1 to i32
    %c0_i32_14 = arith.constant 0 : i32
    %17 = arith.cmpi ne, %16, %c0_i32_14 : i32
    scf.if %17 {
      %c0_15 = arith.constant 0 : index
      %c0_16 = arith.constant 0 : index
      %18 = vector.load %arg6[%c0_15, %c0_16] : memref<8x1xf32, #tpu.memory_space<vmem>>, vector<8x1xf32>
      %cst_17 = arith.constant 1.000000e-18 : f32
      %19 = vector.broadcast %cst_17 : f32 to vector<8x1xf32>
      %20 = arith.maximumf %18, %19 : vector<8x1xf32>
      %21 = math.rsqrt %20 : vector<8x1xf32>
      %c0_18 = arith.constant 0 : index
      %c0_19 = arith.constant 0 : index
      %22 = vector.load %arg5[%c0_18, %c0_19] : memref<8x128xf32, #tpu.memory_space<vmem>>, vector<8x128xf32>
      %23 = vector.broadcast %21 : vector<8x1xf32> to vector<8x128xf32>
      %24 = arith.mulf %22, %23 : vector<8x128xf32>
      %c0_20 = arith.constant 0 : index
      %c0_21 = arith.constant 0 : index
      %25 = vector.load %arg4[%c0_20, %c0_21] : memref<8x128xf32, #tpu.memory_space<vmem>>, vector<8x128xf32>
      tpu.vector_store %arg4[%c0_20, %c0_21], %24 {strides = array<i32>} : memref<8x128xf32, #tpu.memory_space<vmem>>, vector<8x128xf32>,
    } else {
    }
    return
  }
  func.func @transform_0(%arg0: i32, %arg1: i32) -> (i32, i32) {
    %c0_i32 = arith.constant 0 : i32
    return %arg0, %arg1 : i32, i32
  }
  func.func @transform_1(%arg0: i32, %arg1: i32) -> (i32, i32) {
    %c0_i32 = arith.constant 0 : i32
    %c0_i32_0 = arith.constant 0 : i32
    %c0_i32_1 = arith.constant 0 : i32
    return %c0_i32, %c0_i32_0 : i32, i32
  }
  func.func @transform_2(%arg0: i32, %arg1: i32) -> (i32, i32) {
    %c0_i32 = arith.constant 0 : i32
    %c0_i32_0 = arith.constant 0 : i32
    return %arg0, %c0_i32 : i32, i32
  }
}

</mosaic_0001>

<bundles_post_ra>
// kernel: apc_forward.1
= control target key start
LH: loop header
LB: loop body
LE: loop exit
PB: predicated region body
PF: predicated region fallthrough
CT: control target
= control target key end

     0   :  { %7 = vsyncpa [#allocation5], 0  ;;  %s209_s0 = inlined_call_operand.hbm [shape: f32[8,16], index: 0, kind: input, shape index: {}]   ;;  %s210_s1 = inlined_call_operand.hbm [shape: f32[16,128], index: 1, kind: input, shape index: {}]   ;;  %s211_s2 = inlined_call_operand.vmem [shape: f32[8,128], index: 2, kind: output, shape index: {}]  }
   0x1   :  { %s14_s11 = sshll.u32 %s209_s0, 4  ;;  %s15_s11 = int_to_ptr.hbm [resolvable:$true] %s14_s11 }
   0x2   :  { %8 = vsyncpa [#allocation7], 0  ;;  %s177_s12 = smov [#allocation4]   ;;  %s24_s16 = sshll.u32 %s210_s1, 4  ;;  %s25_s16 = int_to_ptr.hbm [resolvable:$true] %s24_s16 }
   0x3   :  { %s16_s13 = sshll.u32 %s177_s12, 4  ;;  %s178_s17 = smov [#allocation6]   ;;  %s17_s13 = int_to_ptr.vmem [resolvable:$true] %s16_s13 }
   0x4   :  { %19 = dma.hbm_to_vmem [thread:$0]  %s15_s11, 128, %s17_s13, [#allocation5]  }
   0x5   :  { %s26_s18 = sshll.u32 %s178_s17, 4  ;;  %s179_s19 = smov 128   ;;  %s27_s18 = int_to_ptr.vmem [resolvable:$true] %s26_s18 }
   0x6   :  { %s180_s20 = smov 8  }
   0x7   :  { %32 = dma.hbm_to_vmem [thread:$0]  %s25_s16, 256, %s27_s18, [#allocation7], %s179_s19, %s179_s19, %s180_s20  }
   0x8   :  { %173 = dma.done.wait [#allocation5], 128  }
   0x9   :  { %174 = vsyncadd [#allocation5], 4294967168 }
   0xa   :  { %175 = dma.done.wait [#allocation7], 256  }
   0xb   :  { %176 = vsyncadd [#allocation7], 4294967040  ;;  %vm46_vm0 = vcmask 7168   ;;  %v181_v0 = vmov 0.0   ;;  %v48_v1 = vld [vmem:[#allocation4] sm:$0xff]  ;;  %vm53_vm1 = vcmask 130048  }
   0xc   :  { %47 = vst.msk [vmem:[#allocation3] sm:$0xff] %vm46_vm0, %v181_v0  ;;  %v52_v2 = vmul.f32 %v48_v1, %v48_v1  ;;  %v50_v4 = vld [vmem:[#allocation6 + $0x8] sm:$0xff]  ;;  %v49_v5 = vld [vmem:[#allocation6] sm:$0xff]  ;;  %v182_v6 = vmov 0  }
   0xd   :  { %78 = vmatpush.msra.mxu0 %v50_v4  ;;  %122 = vset.pattern.permute.xlu0 %v182_v6 }
   0xe   :  { %v54_v3 = vsel %vm53_vm1, %v52_v2, 0.0 }
   0xf   :  { %55 = vadd.xlane.f32.xlu0 %v54_v3  ;;  %79 = vmatpush.msra.mxu0 %v49_v5 }
  0x10   :  { %115 = vmatmul.msk.f32.vlgmr.msra.gmra.mxu0 %vm53_vm1, %v48_v1 }
  0x13   :  { %v51_v7 = vld [vmem:[#allocation3] sm:$0xff] }
  0x82   :  { %v56_v8 = vpop.xlane.xlu0 %55 }
  0x83   :  { %v57_v9 = vadd.f32 %v56_v8, %v51_v7 }
  0x85   :  { %59 = vst.msk [vmem:[#allocation3] sm:$0xff] %vm46_vm0, %v57_v9 }
  0x8c   :  { %v89_v10 = vld [vmem:[#allocation3] sm:$0xff] }
  0x8d   :  { %v90_v11 = vmax.f32 %v89_v10, 1e-18  ;;  %v81_v19 = vpop.f32.mrf.mxu0 }
  0x8f   :  { %123 = vrsqrt.f32 %v90_v11  ;;  %vm97_vm3 = vweird.f32 %v90_v11 }
  0x95   :  { %v124_v12 = vpop.eup %123 }
  0x96   :  { %v92_v13 = vmul.f32 %v124_v12, %v90_v11  ;;  %vm98_vm2 = vweird.f32 %v124_v12 }
  0x97   :  { %vm99_vm4 = vmor %vm97_vm3, %vm98_vm2 }
  0x98   :  { %v93_v14 = vmul.f32 %v124_v12, %v92_v13 }
  0x9a   :  { %v94_v15 = vmul.f32 0.5, %v93_v14 }
  0x9c   :  { %v95_v16 = vsub.f32 1.5, %v94_v15 }
  0x9e   :  { %v96_v17 = vmul.f32 %v124_v12, %v95_v16 }
  0xa0   :  { %v100_v18 = vsel %vm99_vm4, %v124_v12, %v96_v17 }
  0xa1   :  { %104 = vperm.xlu0 %122, %v100_v18  }
 0x113   :  { %v105_v20 = vpop.permute.xlu0 %104 }
 0x114   :  { %v107_v21 = vmul.f32 %v105_v20, %v81_v19 }
 0x116   :  { %108 = vst [vmem:[%s211_s2] sm:$0xff] %v107_v21 }
 0x117   :  { %113 = vsyncpa [#allocation5], 1 }
 0x118   :  { %114 = vsyncpa [#allocation7], 1 }

</bundles_post_ra>
